<compile_context>
chip_gen: v7x
topology: tpu7x:2x2x1
jax: 0.10.0
libtpu: 0.0.40
codegen_flags: <defaults>
</compile_context>

<pallas_src>
import functools

import jax
import jax.numpy as jnp
from jax import lax
from jax.experimental import pallas as pl
from jax.experimental.pallas import tpu as pltpu


def _mix32(x):
    """splitmix32-style finalizer on int32 (bit pattern identical to uint32 math)."""
    x = x ^ lax.shift_right_logical(x, 16)
    x = x * jnp.int32(-2048144789)          # 0x85EBCA6B
    x = x ^ lax.shift_right_logical(x, 13)
    x = x * jnp.int32(-1028477387)          # 0xC2B2AE35
    x = x ^ lax.shift_right_logical(x, 16)
    return x


def _position_kernel(seed_ref, x_ref, pos_ref, out_ref, *,
                     nd, tile_b, tile_f, apply_dropout, thresh_signed, inv_keep):
    # x_ref/out_ref: (tile_b, tile_f) VMEM tiles; pos_ref: (1, tile_f), broadcast over rows.
    emb = x_ref[...] + pos_ref[...]

    if apply_dropout:
        fi = pl.program_id(0)
        bi = pl.program_id(1)
        # Absolute element index in the flattened (B, N*D) array -> mask is independent
        # of the tiling / grid order.
        row = bi * tile_b + lax.broadcasted_iota(jnp.int32, (tile_b, tile_f), 0)
        col = fi * tile_f + lax.broadcasted_iota(jnp.int32, (tile_b, tile_f), 1)
        idx = row * jnp.int32(nd) + col
        h = idx ^ (seed_ref[0] * jnp.int32(-1640531527))   # 0x9E3779B9 (golden ratio)
        h = _mix32(h)
        h = _mix32(h)
        # Unsigned compare h < round(keep_prob * 2^32) done as a sign-flipped int32 compare.
        keep = (h ^ jnp.int32(-(2 ** 31))) < jnp.int32(thresh_signed)
        emb = jnp.where(keep,
                        emb * jnp.asarray(inv_keep, emb.dtype),
                        jnp.zeros([], emb.dtype))

    out_ref[...] = emb.astype(out_ref.dtype)


def _pick_feature_tile(nd, max_tile=2048):
    """Largest multiple-of-128 divisor of nd that is <= max_tile; else the full dim."""
    if nd <= max_tile or nd % 128 != 0:
        return nd
    best = 128
    t = 128
    while t <= max_tile:
        if nd % t == 0:
            best = t
        t += 128
    return best


def position_forward(x, pos_emb, seed=0, *, dropout_p=0.1, training=True):
    """x: (B, N, D); pos_emb: (1, N, D). Returns (B, N, D)."""
    B, N, D = x.shape
    assert pos_emb.shape == (1, N, D)
    ND = N * D

    # Lane-dense view: fold tokens and features into one trailing axis.
    xf = x.reshape(B, ND)
    posf = pos_emb.reshape(1, ND)

    # Tiling: feature tiles are multiples of 128 (or the full axis); small batches stay
    # as one block (full-dim blocks are exempt from the (8,128) rule).
    tile_f = _pick_feature_tile(ND)
    tile_b = 8 if (B > 8 and B % 8 == 0) else B
    num_f = ND // tile_f
    num_b = B // tile_b

    keep_prob = 1.0 - dropout_p
    apply_dropout = bool(training and dropout_p > 0.0)

    # Integer keep-threshold (avoids the float-uniform construction entirely).
    thresh_u = min(int(round(keep_prob * (2 ** 32))), 2 ** 32 - 1)
    thresh_signed = thresh_u ^ 0x80000000
    if thresh_signed >= 2 ** 31:
        thresh_signed -= 2 ** 32
    inv_keep = 1.0 / keep_prob if keep_prob > 0.0 else 0.0

    kernel = functools.partial(
        _position_kernel,
        nd=ND, tile_b=tile_b, tile_f=tile_f,
        apply_dropout=apply_dropout,
        thresh_signed=thresh_signed, inv_keep=inv_keep,
    )

    seed_arr = jnp.asarray([seed], dtype=jnp.int32)
    itemsize = jnp.dtype(x.dtype).itemsize

    out_flat = pl.pallas_call(
        kernel,
        out_shape=jax.ShapeDtypeStruct((B, ND), x.dtype),
        grid_spec=pltpu.PrefetchScalarGridSpec(
            num_scalar_prefetch=1,                       # seed lands in SMEM
            grid=(num_f, num_b),                         # batch innermost -> pos tile reused
            in_specs=[
                pl.BlockSpec((tile_b, tile_f), lambda f, b, seed: (b, f)),   # x tile
                pl.BlockSpec((1, tile_f), lambda f, b, seed: (0, f)),        # shared pos tile
            ],
            out_specs=pl.BlockSpec((tile_b, tile_f), lambda f, b, seed: (b, f)),
        ),
        compiler_params=pltpu.CompilerParams(
            dimension_semantics=("parallel", "parallel"),
        ),
        cost_estimate=pl.CostEstimate(
            flops=B * ND,
            transcendentals=0,
            bytes_accessed=(2 * B * ND + ND) * itemsize,
        ),
    )(seed_arr, xf, posf)

    return out_flat.reshape(B, N, D)


if __name__ == "__main__":
    # Small shapes consistent with the module: batch=2, nums=8 tokens, final_dim=32.
    B, NUMS, FINAL_DIM = 2, 8, 32

    key = jax.random.PRNGKey(0)
    kx, kp = jax.random.split(key)
    x = jax.random.normal(kx, (B, NUMS, FINAL_DIM), dtype=jnp.float32)
    # nn.Parameter(torch.zeros(...)) initializes to zeros; use a deterministic non-zero
    # init here so the add is actually exercised.
    pos_emb = 0.01 * jax.random.normal(kp, (1, NUMS, FINAL_DIM), dtype=jnp.float32)

    # Training-mode forward (with dropout).
    out_train = position_forward(x, pos_emb, seed=123, training=True)
    jax.block_until_ready(out_train)

    # Eval-mode forward (dropout is identity) — check against plain-JAX reference.
    out_eval = position_forward(x, pos_emb, training=False)
    jax.block_until_ready(out_eval)
    ref = x + pos_emb
    assert jnp.allclose(out_eval, ref, atol=1e-6), "eval-mode mismatch vs reference"

    # Sanity on the dropout path: surviving elements equal (x+pos)/keep_prob, rest are zero.
    keep_prob = 0.9
    scaled = ref / keep_prob
    match = jnp.isclose(out_train, scaled, atol=1e-5, rtol=1e-5) | (out_train == 0.0)
    assert bool(jnp.all(match)), "dropout-mode values are not {0, (x+pos)/keep_prob}"

    print("KERNEL_OK")
</pallas_src>

<mosaic_0001>
module attributes {stable_mosaic.version = 11 : i64} {
  func.func @_position_kernel(%arg0: i32, %arg1: i32, %arg2: memref<1xi32, #tpu.memory_space<smem>>, %arg3: memref<2x256xf32, #tpu.memory_space<vmem>>, %arg4: memref<1x256xf32, #tpu.memory_space<vmem>>, %arg5: memref<2x256xf32, #tpu.memory_space<vmem>>) attributes {dimension_semantics = [#tpu.dimension_semantics<parallel>, #tpu.dimension_semantics<parallel>], iteration_bounds = array<i64: 1, 1>, scalar_prefetch = 1 : i64, scratch_operands = 0 : i64, tpu.core_type = #tpu.core_type<tc>, window_params = [{transform_indices = @transform_0, window_bounds = array<i64: 2, 256>}, {transform_indices = @transform_1, window_bounds = array<i64: 1, 256>}, {transform_indices = @transform_2, window_bounds = array<i64: 2, 256>}]} {
    %c0 = arith.constant 0 : index
    %c0_0 = arith.constant 0 : index
    %0 = vector.load %arg3[%c0, %c0_0] : memref<2x256xf32, #tpu.memory_space<vmem>>, vector<2x256xf32>
    %c0_1 = arith.constant 0 : index
    %c0_2 = arith.constant 0 : index
    %1 = vector.load %arg4[%c0_1, %c0_2] : memref<1x256xf32, #tpu.memory_space<vmem>>, vector<1x256xf32>
    %2 = vector.broadcast %1 : vector<1x256xf32> to vector<2x256xf32>
    %3 = arith.addf %0, %2 : vector<2x256xf32>
    %c2_i32 = arith.constant 2 : i32
    %4 = arith.muli %arg1, %c2_i32 : i32
    %5 = tpu.iota {dimensions = array<i32: 0>} : vector<2x256xi32>
    %6 = vector.broadcast %4 : i32 to vector<2x256xi32>
    %7 = arith.addi %6, %5 : vector<2x256xi32>
    %c256_i32 = arith.constant 256 : i32
    %8 = arith.muli %arg0, %c256_i32 : i32
    %9 = tpu.iota {dimensions = array<i32: 1>} : vector<2x256xi32>
    %10 = vector.broadcast %8 : i32 to vector<2x256xi32>
    %11 = arith.addi %10, %9 : vector<2x256xi32>
    %c256_i32_3 = arith.constant 256 : i32
    %12 = vector.broadcast %c256_i32_3 : i32 to vector<2x256xi32>
    %13 = arith.muli %7, %12 : vector<2x256xi32>
    %14 = arith.addi %13, %11 : vector<2x256xi32>
    %c0_4 = arith.constant 0 : index
    %15 = memref.load %arg2[%c0_4] : memref<1xi32, #tpu.memory_space<smem>>
    %c-1640531527_i32 = arith.constant -1640531527 : i32
    %16 = arith.muli %15, %c-1640531527_i32 : i32
    %17 = vector.broadcast %16 : i32 to vector<2x256xi32>
    %18 = arith.xori %14, %17 : vector<2x256xi32>
    %c16_i32 = arith.constant 16 : i32
    %19 = vector.broadcast %c16_i32 : i32 to vector<2x256xi32>
    %20 = arith.shrui %18, %19 : vector<2x256xi32>
    %21 = arith.xori %18, %20 : vector<2x256xi32>
    %c-2048144789_i32 = arith.constant -2048144789 : i32
    %22 = vector.broadcast %c-2048144789_i32 : i32 to vector<2x256xi32>
    %23 = arith.muli %21, %22 : vector<2x256xi32>
    %c13_i32 = arith.constant 13 : i32
    %24 = vector.broadcast %c13_i32 : i32 to vector<2x256xi32>
    %25 = arith.shrui %23, %24 : vector<2x256xi32>
    %26 = arith.xori %23, %25 : vector<2x256xi32>
    %c-1028477387_i32 = arith.constant -1028477387 : i32
    %27 = vector.broadcast %c-1028477387_i32 : i32 to vector<2x256xi32>
    %28 = arith.muli %26, %27 : vector<2x256xi32>
    %c16_i32_5 = arith.constant 16 : i32
    %29 = vector.broadcast %c16_i32_5 : i32 to vector<2x256xi32>
    %30 = arith.shrui %28, %29 : vector<2x256xi32>
    %31 = arith.xori %28, %30 : vector<2x256xi32>
    %c16_i32_6 = arith.constant 16 : i32
    %32 = vector.broadcast %c16_i32_6 : i32 to vector<2x256xi32>
    %33 = arith.shrui %31, %32 : vector<2x256xi32>
    %34 = arith.xori %31, %33 : vector<2x256xi32>
    %c-2048144789_i32_7 = arith.constant -2048144789 : i32
    %35 = vector.broadcast %c-2048144789_i32_7 : i32 to vector<2x256xi32>
    %36 = arith.muli %34, %35 : vector<2x256xi32>
    %c13_i32_8 = arith.constant 13 : i32
    %37 = vector.broadcast %c13_i32_8 : i32 to vector<2x256xi32>
    %38 = arith.shrui %36, %37 : vector<2x256xi32>
    %39 = arith.xori %36, %38 : vector<2x256xi32>
    %c-1028477387_i32_9 = arith.constant -1028477387 : i32
    %40 = vector.broadcast %c-1028477387_i32_9 : i32 to vector<2x256xi32>
    %41 = arith.muli %39, %40 : vector<2x256xi32>
    %c16_i32_10 = arith.constant 16 : i32
    %42 = vector.broadcast %c16_i32_10 : i32 to vector<2x256xi32>
    %43 = arith.shrui %41, %42 : vector<2x256xi32>
    %44 = arith.xori %41, %43 : vector<2x256xi32>
    %c-2147483648_i32 = arith.constant -2147483648 : i32
    %45 = vector.broadcast %c-2147483648_i32 : i32 to vector<2x256xi32>
    %46 = arith.xori %44, %45 : vector<2x256xi32>
    %c1717986918_i32 = arith.constant 1717986918 : i32
    %47 = vector.broadcast %c1717986918_i32 : i32 to vector<2x256xi32>
    %48 = arith.cmpi slt, %46, %47 : vector<2x256xi32>
    %cst = arith.constant 1.11111116 : f32
    %49 = vector.broadcast %cst : f32 to vector<2x256xf32>
    %50 = arith.mulf %3, %49 : vector<2x256xf32>
    %cst_11 = arith.constant 0.000000e+00 : f32
    %51 = vector.broadcast %cst_11 : f32 to vector<2x256xf32>
    %52 = arith.select %48, %50, %51 : vector<2x256xi1>, vector<2x256xf32>
    %c0_12 = arith.constant 0 : index
    %c0_13 = arith.constant 0 : index
    %53 = vector.load %arg5[%c0_12, %c0_13] : memref<2x256xf32, #tpu.memory_space<vmem>>, vector<2x256xf32>
    tpu.vector_store %arg5[%c0_12, %c0_13], %52 {strides = array<i32>} : memref<2x256xf32, #tpu.memory_space<vmem>>, vector<2x256xf32>,
    return
  }
  func.func @transform_0(%arg0: i32, %arg1: i32, %arg2: memref<1xi32, #tpu.memory_space<smem>>) -> (i32, i32) {
    %c0_i32 = arith.constant 0 : i32
    return %arg1, %arg0 : i32, i32
  }
  func.func @transform_1(%arg0: i32, %arg1: i32, %arg2: memref<1xi32, #tpu.memory_space<smem>>) -> (i32, i32) {
    %c0_i32 = arith.constant 0 : i32
    %c0_i32_0 = arith.constant 0 : i32
    return %c0_i32, %arg0 : i32, i32
  }
  func.func @transform_2(%arg0: i32, %arg1: i32, %arg2: memref<1xi32, #tpu.memory_space<smem>>) -> (i32, i32) {
    %c0_i32 = arith.constant 0 : i32
    return %arg1, %arg0 : i32, i32
  }
}

</mosaic_0001>

<bundles_post_ra>
// kernel: tpu_custom_call.1
= control target key start
LH: loop header
LB: loop body
LE: loop exit
PB: predicated region body
PF: predicated region fallthrough
CT: control target
= control target key end

     0   :  { %9 = vsyncpa [#allocation5], 0  ;;  %s249_s0 = inlined_call_operand.<no memory space> [shape: s32[1], index: 0, kind: input, shape index: {}]   ;;  %s250_s1 = inlined_call_operand.hbm [shape: f32[2,256], index: 1, kind: input, shape index: {}]   ;;  %s251_s2 = inlined_call_operand.vmem [shape: f32[1,256], index: 2, kind: input, shape index: {}]   ;;  %s252_s3 = inlined_call_operand.hbm [shape: f32[2,256], index: 3, kind: output, shape index: {}]  }
   0x1   :  { %10 = vsyncpa [#allocation6], 0  ;;  %s196_s12 = smov [#allocation4]   ;;  %s148_s16 = scalar_lea.hbm %s250_s1, 64 }
   0x2   :  { %s17_s13 = sshll.u32 %s196_s12, 4  ;;  %p149_p0 = scmp.ne.s32.totalorder %s250_s1, %s148_s16  ;;  %s18_s13 = int_to_ptr.vmem [resolvable:$true] %s17_s13 }
   0x3   :  { %p152_p1 = scmp.lt.u32.totalorder %s148_s16, %s250_s1 }
   0x5   :  { %p154_p2 = pnand %p152_p1, %p149_p0 }
   0x7   :  { %157 = shalt.err (!%p154_p2)
}
   0x8   :  { %s158_s21 = scalar_lea.vmem %s18_s13, 64  ;;  %p163_p4 = scmp.lt.s32.totalorder %s18_s13, %s18_s13 }
   0x9   :  { %p159_p3 = scmp.ne.s32.totalorder %s18_s13, %s158_s21  ;;  %p164_p5 = scmp.lt.s32.totalorder %s158_s21, %s158_s21 }
   0xb   :  { %p165_p6 = por %p164_p5, %p163_p4 }
   0xd   :  { %p166_p7 = pnand %p165_p6, %p159_p3 }
   0xf   :  { %169 = shalt.err (!%p166_p7)
}
  0x10   :  { %20 = dma.hbm_to_vmem [thread:$0]  %s250_s1, 64, %s18_s13, [#allocation5]  }
  0x11   :  { %192 = dma.done.wait [#allocation5], 64  }
  0x12   :  { %193 = vsyncadd [#allocation5], 4294967232  ;;  %v29_v0 = vlaneseq  ;;  %s63_s26 = smul.u32 2654435769, %s249_s0  ;;  %v197_v16 = vmov 1983009808  }
  0x13   :  { %v39_v17 = vunpack.c.l.s4 %v197_v16  ;;  %v27_v18 = vld [vmem:[%s251_s2] sm:$0x3]  ;;  %s198_s0 = smov [#allocation7]  }
  0x14   :  { %v30_v1 = vshrl.u32 %v29_v0, 7  ;;  %v54_v2 = vand.u32 127, %v29_v0  ;;  %v64_v5 = vstv %s63_s26  ;;  %v26_v37 = vld [vmem:[#allocation4] sm:$0xf]  ;;  %s135_s2 = sshll.u32 %s198_s0, 4  ;;  %s136_s2 = int_to_ptr.vmem [resolvable:$true] %s135_s2 }
  0x15   :  { %v40_v25 = vunpack.c.0.s8 %v39_v17  ;;  %s170_s28 = scalar_lea.vmem %s136_s2, 64  ;;  %p175_p9 = scmp.lt.s32.totalorder %s136_s2, %s136_s2 }
  0x16   :  { %v55_v3 = vadd.s32 128, %v54_v2  ;;  %v59_v4 = vmul.u32 256, %v30_v1  ;;  %v31_v14 = vsub.s32 0, %v30_v1  ;;  %v35_v15 = vsub.s32 1, %v30_v1  ;;  %p171_p8 = scmp.ne.s32.totalorder %s136_s2, %s170_s28  ;;  %p176_p10 = scmp.lt.s32.totalorder %s170_s28, %s170_s28 }
  0x17   :  { %v43_v31 = vsub.s32 %v40_v25, %v30_v1 }
  0x18   :  { %v60_v6 = vadd.s32 %v59_v4, %v54_v2  ;;  %v61_v7 = vadd.s32 %v59_v4, %v55_v3  ;;  %v32_v23 = vrot.slane %v27_v18, %v31_v14  ;;  %v36_v24 = vrot.slane %v27_v18, %v35_v15  ;;  %p177_p11 = por %p176_p10, %p175_p9 }
  0x1a   :  { %v65_v8 = vxor.u32 %v64_v5, %v60_v6  ;;  %v66_v9 = vxor.u32 %v64_v5, %v61_v7  ;;  %v37_v30 = vcombine.low %v32_v23, %v36_v24  ;;  %p178_p12 = pnand %p177_p11, %p171_p8 }
  0x1c   :  { %v67_v10 = vshrl.u32 %v65_v8, 16  ;;  %v68_v11 = vshrl.u32 %v66_v9, 16  ;;  %v44_v36 = vrot.slane %v37_v30, %v43_v31 }
  0x1e   :  { %v69_v12 = vxor.u32 %v67_v10, %v65_v8  ;;  %v70_v13 = vxor.u32 %v68_v11, %v66_v9  ;;  %v46_v42 = vadd.f32 %v44_v36, %v26_v37 }
  0x20   :  { %v71_v19 = vmul.u32 2246822507, %v69_v12  ;;  %v72_v20 = vmul.u32 2246822507, %v70_v13  ;;  %v103_v47 = vmul.f32 1.1111112, %v46_v42 }
  0x22   :  { %v73_v21 = vshrl.u32 %v71_v19, 13  ;;  %v74_v22 = vshrl.u32 %v72_v20, 13  ;;  %v111_v52 = vrot.slane %v103_v47, %v43_v31 }
  0x24   :  { %v75_v26 = vxor.u32 %v73_v21, %v71_v19  ;;  %v76_v27 = vxor.u32 %v74_v22, %v72_v20  ;;  %v112_v57 = vcombine.high %v111_v52, %v111_v52 }
  0x26   :  { %v77_v28 = vmul.u32 3266489909, %v75_v26  ;;  %v78_v29 = vmul.u32 3266489909, %v76_v27 }
  0x28   :  { %v79_v32 = vshrl.u32 %v77_v28, 16  ;;  %v80_v33 = vshrl.u32 %v78_v29, 16 }
  0x2a   :  { %v81_v34 = vxor.u32 %v79_v32, %v77_v28  ;;  %v82_v35 = vxor.u32 %v80_v33, %v78_v29 }
  0x2c   :  { %v83_v38 = vshrl.u32 %v81_v34, 16  ;;  %v84_v39 = vshrl.u32 %v82_v35, 16 }
  0x2e   :  { %v85_v40 = vxor.u32 %v83_v38, %v81_v34  ;;  %v86_v41 = vxor.u32 %v84_v39, %v82_v35 }
  0x30   :  { %v87_v43 = vmul.u32 2246822507, %v85_v40  ;;  %v88_v44 = vmul.u32 2246822507, %v86_v41 }
  0x32   :  { %v89_v45 = vshrl.u32 %v87_v43, 13  ;;  %v90_v46 = vshrl.u32 %v88_v44, 13 }
  0x34   :  { %v91_v48 = vxor.u32 %v89_v45, %v87_v43  ;;  %v92_v49 = vxor.u32 %v90_v46, %v88_v44 }
  0x36   :  { %v93_v50 = vmul.u32 3266489909, %v91_v48  ;;  %v94_v51 = vmul.u32 3266489909, %v92_v49 }
  0x38   :  { %v95_v53 = vshrl.u32 %v93_v50, 16  ;;  %v96_v54 = vshrl.u32 %v94_v51, 16 }
  0x3a   :  { %v97_v55 = vxor.u32 %v95_v53, %v93_v50  ;;  %v98_v56 = vxor.u32 %v96_v54, %v94_v51 }
  0x3c   :  { %v99_v58 = vxor.u32 2147483648, %v97_v55  ;;  %v100_v59 = vxor.u32 2147483648, %v98_v56 }
  0x3e   :  { %vm101_vm0 = vcmp.lt.s32.totalorder %v99_v58, 1717986918  ;;  %vm102_vm1 = vcmp.lt.s32.totalorder %v100_v59, 1717986918 }
  0x3f   :  { %v115_v60 = vsel %vm101_vm0, %v111_v52, 0.0  ;;  %v116_v61 = vsel %vm102_vm1, %v112_v57, 0.0 }
  0x40   :  { %v119_v62 = vcombine.low %v115_v60, %v116_v61 }
  0x42   :  { %144 = vst.sshfl [vmem:[#allocation7] sm:$0x33 pattern:$0x76325410] %v119_v62 }
  0x43   :  { %181 = shalt.err (!%p178_p12)
}
  0x44   :  { %s182_s4 = scalar_lea.hbm %s252_s3, 64 }
  0x45   :  { %p183_p13 = scmp.ne.s32.totalorder %s252_s3, %s182_s4  ;;  %p186_p0 = scmp.lt.u32.totalorder %s182_s4, %s252_s3 }
  0x47   :  { %p188_p1 = pnand %p186_p0, %p183_p13 }
  0x49   :  { %191 = shalt.err (!%p188_p1)
}
  0x4a   :  { %138 = dma.vmem_to_hbm [thread:$0]  %s136_s2, 64, %s252_s3, [#allocation6]  }
  0x4b   :  { %194 = dma.done.wait [#allocation6], 64  }
  0x4c   :  { %195 = vsyncadd [#allocation6], 4294967232 }
  0x4d   :  { %142 = vsyncpa [#allocation5], 1 }
  0x4e   :  { %143 = vsyncpa [#allocation6], 1 }

</bundles_post_ra>
